<compile_context>
chip_gen: v5e
topology: v5e:2x2
jax: 0.10.0
libtpu: 0.0.40
codegen_flags: <defaults>
</compile_context>

<pallas_src>
import functools
import math

import jax
import jax.numpy as jnp
from jax.experimental import pallas as pl
from jax.experimental.pallas import tpu as pltpu


# ---------------------------------------------------------------------------
# Fused kernel: whole residual block for B images per grid step.
# ---------------------------------------------------------------------------
def _residual_block_kernel(x_ref, w1_ref, w2_ref, w3_ref, mask_ref,
                           o_ref, tap_ref, *, W):
    # x_ref   : (B*Cin, HW)        lane-dense slab, channels on sublanes
    # w1_ref  : (B*C2,  B*Cin)     conv1 weight, block-diagonal over images
    # w2_ref  : (B*C2,  9*B*C2)    conv2 weight, [cout, (tap, image, cin)]
    # w3_ref  : (B*Cin, B*C2)      conv3 weight, block-diagonal over images
    # mask_ref: (9, 1, HW)         {0,1} border masks (zero padding in-kernel)
    # o_ref   : (B*Cin, HW)
    # tap_ref : (9*B*C2, HW) f32   VMEM scratch holding the stacked taps
    x = x_ref[...]
    bc2 = w1_ref.shape[0]
    hw = x.shape[1]

    # conv1 (1x1) + relu: one MXU matmul, f32 accumulation.
    h1 = jnp.maximum(
        jnp.dot(w1_ref[...], x, preferred_element_type=jnp.float32), 0.0)

    # conv2 (3x3, pad=1): each tap (dy, dx) is a lane rotation (XLU) of the
    # resident slab by dy*W + dx; border pixels are zeroed with the
    # precomputed masks.  Taps are stacked into VMEM so the conv reduces to a
    # single fused K = 9*B*C2 matmul below.
    masks = mask_ref[...]                       # (9, 1, HW)
    for t in range(9):                          # statically unrolled
        dy, dx = t // 3 - 1, t % 3 - 1
        off = dy * W + dx
        rolled = h1 if off == 0 else pltpu.roll(h1, (-off) % hw, 1)
        masked = rolled if t == 4 else rolled * masks[t]   # center tap: no mask
        tap_ref[pl.ds(t * bc2, bc2), :] = masked

    # conv2 accumulation (ONE matmul) + relu.
    h2 = jnp.maximum(
        jnp.dot(w2_ref[...], tap_ref[...], preferred_element_type=jnp.float32),
        0.0)

    # conv3 (1x1) + relu + residual add.
    y = jnp.maximum(
        jnp.dot(w3_ref[...], h2, preferred_element_type=jnp.float32), 0.0)
    o_ref[...] = (x.astype(jnp.float32) + y).astype(o_ref.dtype)


# ---------------------------------------------------------------------------
# Wrapper: free reshapes (no transposes), block-diag weights, pallas_call.
# ---------------------------------------------------------------------------
def residual_block_d(x_nchw, w1, w2, w3, images_per_step=None):
    """x_nchw: (N, Cin, H, W); w1: (Cin, 2Cin) [cin, cout];
    w2: (3, 3, 2Cin, 2Cin) HWIO; w3: (2Cin, Cin) [cin, cout]."""
    N, Cin, H, W = x_nchw.shape
    C2 = w1.shape[1]
    HW = H * W
    dtype = x_nchw.dtype

    if images_per_step is None:
        # Amortize the per-grid-step overhead (sequential grid on v5e/v6e)
        # while keeping >= 2 parallel steps so both v7x TensorCores stay busy.
        images_per_step = 1
        for b in (8, 4, 2):
            if N % b == 0 and N // b >= 2:
                images_per_step = b
                break
    B = images_per_step
    assert N % B == 0, "batch must be divisible by images_per_step"
    BCin, BC2 = B * Cin, B * C2

    # FREE reshape only (no HBM round trip): the kernel sees (B*Cin, HW)
    # with HW = H*W on the 128-lane axis.
    x3 = x_nchw.reshape(N // B, BCin, HW)

    eye = jnp.eye(B, dtype=dtype)

    def block_diag(w):  # (O, I) -> (B*O, B*I), block-diagonal over images
        O, I = w.shape
        return (eye[:, None, :, None] * w[None, :, None, :]).reshape(B * O, B * I)

    w1f = block_diag(w1.T.astype(dtype))                     # (B*C2, B*Cin)
    w3f = block_diag(w3.T.astype(dtype))                     # (B*Cin, B*C2)
    # conv2 weight: tap-major [cout, cin] per tap, fused + block-diagonal:
    # w2f[b*C2+o, t*B*C2 + b2*C2 + c] = w2[t, o, c] * (b == b2)
    w2t = jnp.transpose(w2, (0, 1, 3, 2)).reshape(9, C2, C2).astype(dtype)
    w2f = jnp.einsum("toc,bB->botBc", w2t, eye).reshape(BC2, 9 * BC2)

    # Precomputed {0,1} border masks per tap (implements the zero padding).
    pos = jnp.arange(HW, dtype=jnp.int32)
    row, col = pos // W, pos % W
    mask_rows = []
    for t in range(9):
        dy, dx = t // 3 - 1, t % 3 - 1
        ok = (row + dy >= 0) & (row + dy < H) & (col + dx >= 0) & (col + dx < W)
        mask_rows.append(ok)
    masks = jnp.stack(mask_rows).astype(dtype).reshape(9, 1, HW)

    kernel = functools.partial(_residual_block_kernel, W=W)

    out3 = pl.pallas_call(
        kernel,
        out_shape=jax.ShapeDtypeStruct((N // B, BCin, HW), dtype),
        grid=(N // B,),
        in_specs=[
            pl.BlockSpec((None, BCin, HW), lambda g: (g, 0, 0)),
            pl.BlockSpec((BC2, BCin), lambda g: (0, 0)),
            pl.BlockSpec((BC2, 9 * BC2), lambda g: (0, 0)),
            pl.BlockSpec((BCin, BC2), lambda g: (0, 0)),
            pl.BlockSpec((9, 1, HW), lambda g: (0, 0, 0)),
        ],
        out_specs=pl.BlockSpec((None, BCin, HW), lambda g: (g, 0, 0)),
        scratch_shapes=[pltpu.VMEM((9 * BC2, HW), jnp.float32)],
        compiler_params=pltpu.CompilerParams(
            dimension_semantics=("parallel",)),
    )(x3, w1f, w2f, w3f, masks)

    # Free reshape back to the module's NCHW layout.
    return out3.reshape(N, Cin, H, W)


# ---------------------------------------------------------------------------
# Pure-JAX reference (for correctness check), NCHW like the PyTorch module.
# ---------------------------------------------------------------------------
def _ref_forward_nchw(x, w1, w2, w3):
    dn = ("NCHW", "HWIO", "NCHW")
    h = jax.lax.conv_general_dilated(
        x, w1.reshape(1, 1, *w1.shape), (1, 1), "VALID", dimension_numbers=dn)
    h = jnp.maximum(h, 0.0)
    h = jax.lax.conv_general_dilated(
        h, w2, (1, 1), "SAME", dimension_numbers=dn)
    h = jnp.maximum(h, 0.0)
    h = jax.lax.conv_general_dilated(
        h, w3.reshape(1, 1, *w3.shape), (1, 1), "VALID", dimension_numbers=dn)
    h = jnp.maximum(h, 0.0)
    return x + h


# ---------------------------------------------------------------------------
if __name__ == "__main__":
    indim = 4
    C2 = 2 * indim
    H = W = 16

    key = jax.random.PRNGKey(0)
    k0, k1, k2, k3, k4 = jax.random.split(key, 5)

    # Deterministic weight init mirroring the module: normal(0, sqrt(2/n)),
    # n = KH*KW*Cout.  Stored as (Cin, Cout) for 1x1 convs and HWIO for 3x3.
    w1 = jax.random.normal(k1, (indim, C2), jnp.float32) * math.sqrt(2.0 / (1 * 1 * C2))
    w2 = jax.random.normal(k2, (3, 3, C2, C2), jnp.float32) * math.sqrt(2.0 / (3 * 3 * C2))
    w3 = jax.random.normal(k3, (C2, indim), jnp.float32) * math.sqrt(2.0 / (1 * 1 * indim))

    # Case 1: the module's nominal shape (N=2) -> 1 image/step, 2 parallel steps.
    x_a = jax.random.normal(k0, (2, indim, H, W), jnp.float32)
    out_a = residual_block_d(x_a, w1, w2, w3)
    jax.block_until_ready(out_a)
    ref_a = _ref_forward_nchw(x_a, w1, w2, w3)
    assert out_a.shape == x_a.shape
    assert jnp.allclose(out_a, ref_a, atol=5e-4, rtol=5e-4), "mismatch vs reference (B=1)"

    # Case 2: exercises the B=4 images-per-step (block-diagonal) path.
    x_b = jax.random.normal(k4, (8, indim, H, W), jnp.float32)
    out_b = residual_block_d(x_b, w1, w2, w3)
    jax.block_until_ready(out_b)
    ref_b = _ref_forward_nchw(x_b, w1, w2, w3)
    assert jnp.allclose(out_b, ref_b, atol=5e-4, rtol=5e-4), "mismatch vs reference (B=4)"

    print("KERNEL_OK")
</pallas_src>

<mosaic_0001>
module attributes {stable_mosaic.version = 11 : i64} {
  func.func @_residual_block_kernel(%arg0: i32, %arg1: memref<1x4x256xf32, #tpu.memory_space<vmem>>, %arg2: memref<8x4xf32, #tpu.memory_space<vmem>>, %arg3: memref<8x72xf32, #tpu.memory_space<vmem>>, %arg4: memref<4x8xf32, #tpu.memory_space<vmem>>, %arg5: memref<9x1x256xf32, #tpu.memory_space<vmem>>, %arg6: memref<1x4x256xf32, #tpu.memory_space<vmem>>, %arg7: memref<72x256xf32, #tpu.memory_space<vmem>>) attributes {dimension_semantics = [#tpu.dimension_semantics<parallel>], iteration_bounds = array<i64: 2>, scalar_prefetch = 0 : i64, scratch_operands = 1 : i64, tpu.core_type = #tpu.core_type<tc>, window_params = [{transform_indices = @transform_0, window_bounds = array<i64: 1, 4, 256>}, {pipeline_mode = #tpu.pipeline_mode<synchronous>, transform_indices = @transform_1, window_bounds = array<i64: 8, 4>}, {pipeline_mode = #tpu.pipeline_mode<synchronous>, transform_indices = @transform_2, window_bounds = array<i64: 8, 72>}, {pipeline_mode = #tpu.pipeline_mode<synchronous>, transform_indices = @transform_3, window_bounds = array<i64: 4, 8>}, {pipeline_mode = #tpu.pipeline_mode<synchronous>, transform_indices = @transform_4, window_bounds = array<i64: 9, 1, 256>}, {transform_indices = @transform_5, window_bounds = array<i64: 1, 4, 256>}]} {
    %c0 = arith.constant 0 : index
    %c0_0 = arith.constant 0 : index
    %c0_1 = arith.constant 0 : index
    %0 = vector.load %arg1[%c0, %c0_0, %c0_1] : memref<1x4x256xf32, #tpu.memory_space<vmem>>, vector<1x4x256xf32>
    %1 = vector.shape_cast %0 : vector<1x4x256xf32> to vector<4x256xf32>
    %c0_2 = arith.constant 0 : index
    %c0_3 = arith.constant 0 : index
    %2 = vector.load %arg2[%c0_2, %c0_3] : memref<8x4xf32, #tpu.memory_space<vmem>>, vector<8x4xf32>
    %cst = arith.constant dense<0.000000e+00> : vector<8x256xf32>
    %3 = tpu.matmul %2, %1, %cst {dimension_numbers = #tpu.dot_dimension_numbers<[1], [0], [0], [1], [0, 0, 1, 1], [], []>} : vector<8x4xf32>, vector<4x256xf32>, vector<8x256xf32> -> vector<8x256xf32>
    %cst_4 = arith.constant 0.000000e+00 : f32
    %4 = vector.broadcast %cst_4 : f32 to vector<8x256xf32>
    %5 = arith.maximumf %3, %4 : vector<8x256xf32>
    %c0_5 = arith.constant 0 : index
    %c0_6 = arith.constant 0 : index
    %c0_7 = arith.constant 0 : index
    %6 = vector.load %arg5[%c0_5, %c0_6, %c0_7] : memref<9x1x256xf32, #tpu.memory_space<vmem>>, vector<9x1x256xf32>
    %c17_i32 = arith.constant 17 : i32
    %7 = tpu.dynamic_rotate %5 by %c17_i32 dim 1 : vector<8x256xf32>, i32 -> vector<8x256xf32>
    %8 = vector.extract_strided_slice %6 {offsets = [0, 0, 0], sizes = [1, 1, 256], strides = [1, 1, 1]} : vector<9x1x256xf32> to vector<1x1x256xf32>
    %9 = vector.shape_cast %8 : vector<1x1x256xf32> to vector<1x256xf32>
    %10 = vector.broadcast %9 : vector<1x256xf32> to vector<8x256xf32>
    %11 = arith.mulf %7, %10 : vector<8x256xf32>
    %c0_8 = arith.constant 0 : index
    %c0_9 = arith.constant 0 : index
    %12 = vector.load %arg7[%c0_8, %c0_9] : memref<72x256xf32, #tpu.memory_space<vmem>>, vector<8x256xf32>
    tpu.vector_store %arg7[%c0_8, %c0_9], %11 {strides = array<i32>} : memref<72x256xf32, #tpu.memory_space<vmem>>, vector<8x256xf32>,
    %c16_i32 = arith.constant 16 : i32
    %13 = tpu.dynamic_rotate %5 by %c16_i32 dim 1 : vector<8x256xf32>, i32 -> vector<8x256xf32>
    %14 = vector.extract_strided_slice %6 {offsets = [1, 0, 0], sizes = [1, 1, 256], strides = [1, 1, 1]} : vector<9x1x256xf32> to vector<1x1x256xf32>
    %15 = vector.shape_cast %14 : vector<1x1x256xf32> to vector<1x256xf32>
    %16 = vector.broadcast %15 : vector<1x256xf32> to vector<8x256xf32>
    %17 = arith.mulf %13, %16 : vector<8x256xf32>
    %c8 = arith.constant 8 : index
    %c0_10 = arith.constant 0 : index
    %18 = vector.load %arg7[%c8, %c0_10] : memref<72x256xf32, #tpu.memory_space<vmem>>, vector<8x256xf32>
    tpu.vector_store %arg7[%c8, %c0_10], %17 {strides = array<i32>} : memref<72x256xf32, #tpu.memory_space<vmem>>, vector<8x256xf32>,
    %c15_i32 = arith.constant 15 : i32
    %19 = tpu.dynamic_rotate %5 by %c15_i32 dim 1 : vector<8x256xf32>, i32 -> vector<8x256xf32>
    %20 = vector.extract_strided_slice %6 {offsets = [2, 0, 0], sizes = [1, 1, 256], strides = [1, 1, 1]} : vector<9x1x256xf32> to vector<1x1x256xf32>
    %21 = vector.shape_cast %20 : vector<1x1x256xf32> to vector<1x256xf32>
    %22 = vector.broadcast %21 : vector<1x256xf32> to vector<8x256xf32>
    %23 = arith.mulf %19, %22 : vector<8x256xf32>
    %c16 = arith.constant 16 : index
    %c0_11 = arith.constant 0 : index
    %24 = vector.load %arg7[%c16, %c0_11] : memref<72x256xf32, #tpu.memory_space<vmem>>, vector<8x256xf32>
    tpu.vector_store %arg7[%c16, %c0_11], %23 {strides = array<i32>} : memref<72x256xf32, #tpu.memory_space<vmem>>, vector<8x256xf32>,
    %c1_i32 = arith.constant 1 : i32
    %25 = tpu.dynamic_rotate %5 by %c1_i32 dim 1 : vector<8x256xf32>, i32 -> vector<8x256xf32>
    %26 = vector.extract_strided_slice %6 {offsets = [3, 0, 0], sizes = [1, 1, 256], strides = [1, 1, 1]} : vector<9x1x256xf32> to vector<1x1x256xf32>
    %27 = vector.shape_cast %26 : vector<1x1x256xf32> to vector<1x256xf32>
    %28 = vector.broadcast %27 : vector<1x256xf32> to vector<8x256xf32>
    %29 = arith.mulf %25, %28 : vector<8x256xf32>
    %c24 = arith.constant 24 : index
    %c0_12 = arith.constant 0 : index
    %30 = vector.load %arg7[%c24, %c0_12] : memref<72x256xf32, #tpu.memory_space<vmem>>, vector<8x256xf32>
    tpu.vector_store %arg7[%c24, %c0_12], %29 {strides = array<i32>} : memref<72x256xf32, #tpu.memory_space<vmem>>, vector<8x256xf32>,
    %c32 = arith.constant 32 : index
    %c0_13 = arith.constant 0 : index
    %31 = vector.load %arg7[%c32, %c0_13] : memref<72x256xf32, #tpu.memory_space<vmem>>, vector<8x256xf32>
    tpu.vector_store %arg7[%c32, %c0_13], %5 {strides = array<i32>} : memref<72x256xf32, #tpu.memory_space<vmem>>, vector<8x256xf32>,
    %c255_i32 = arith.constant 255 : i32
    %32 = tpu.dynamic_rotate %5 by %c255_i32 dim 1 : vector<8x256xf32>, i32 -> vector<8x256xf32>
    %33 = vector.extract_strided_slice %6 {offsets = [5, 0, 0], sizes = [1, 1, 256], strides = [1, 1, 1]} : vector<9x1x256xf32> to vector<1x1x256xf32>
    %34 = vector.shape_cast %33 : vector<1x1x256xf32> to vector<1x256xf32>
    %35 = vector.broadcast %34 : vector<1x256xf32> to vector<8x256xf32>
    %36 = arith.mulf %32, %35 : vector<8x256xf32>
    %c40 = arith.constant 40 : index
    %c0_14 = arith.constant 0 : index
    %37 = vector.load %arg7[%c40, %c0_14] : memref<72x256xf32, #tpu.memory_space<vmem>>, vector<8x256xf32>
    tpu.vector_store %arg7[%c40, %c0_14], %36 {strides = array<i32>} : memref<72x256xf32, #tpu.memory_space<vmem>>, vector<8x256xf32>,
    %c241_i32 = arith.constant 241 : i32
    %38 = tpu.dynamic_rotate %5 by %c241_i32 dim 1 : vector<8x256xf32>, i32 -> vector<8x256xf32>
    %39 = vector.extract_strided_slice %6 {offsets = [6, 0, 0], sizes = [1, 1, 256], strides = [1, 1, 1]} : vector<9x1x256xf32> to vector<1x1x256xf32>
    %40 = vector.shape_cast %39 : vector<1x1x256xf32> to vector<1x256xf32>
    %41 = vector.broadcast %40 : vector<1x256xf32> to vector<8x256xf32>
    %42 = arith.mulf %38, %41 : vector<8x256xf32>
    %c48 = arith.constant 48 : index
    %c0_15 = arith.constant 0 : index
    %43 = vector.load %arg7[%c48, %c0_15] : memref<72x256xf32, #tpu.memory_space<vmem>>, vector<8x256xf32>
    tpu.vector_store %arg7[%c48, %c0_15], %42 {strides = array<i32>} : memref<72x256xf32, #tpu.memory_space<vmem>>, vector<8x256xf32>,
    %c240_i32 = arith.constant 240 : i32
    %44 = tpu.dynamic_rotate %5 by %c240_i32 dim 1 : vector<8x256xf32>, i32 -> vector<8x256xf32>
    %45 = vector.extract_strided_slice %6 {offsets = [7, 0, 0], sizes = [1, 1, 256], strides = [1, 1, 1]} : vector<9x1x256xf32> to vector<1x1x256xf32>
    %46 = vector.shape_cast %45 : vector<1x1x256xf32> to vector<1x256xf32>
    %47 = vector.broadcast %46 : vector<1x256xf32> to vector<8x256xf32>
    %48 = arith.mulf %44, %47 : vector<8x256xf32>
    %c56 = arith.constant 56 : index
    %c0_16 = arith.constant 0 : index
    %49 = vector.load %arg7[%c56, %c0_16] : memref<72x256xf32, #tpu.memory_space<vmem>>, vector<8x256xf32>
    tpu.vector_store %arg7[%c56, %c0_16], %48 {strides = array<i32>} : memref<72x256xf32, #tpu.memory_space<vmem>>, vector<8x256xf32>,
    %c239_i32 = arith.constant 239 : i32
    %50 = tpu.dynamic_rotate %5 by %c239_i32 dim 1 : vector<8x256xf32>, i32 -> vector<8x256xf32>
    %51 = vector.extract_strided_slice %6 {offsets = [8, 0, 0], sizes = [1, 1, 256], strides = [1, 1, 1]} : vector<9x1x256xf32> to vector<1x1x256xf32>
    %52 = vector.shape_cast %51 : vector<1x1x256xf32> to vector<1x256xf32>
    %53 = vector.broadcast %52 : vector<1x256xf32> to vector<8x256xf32>
    %54 = arith.mulf %50, %53 : vector<8x256xf32>
    %c64 = arith.constant 64 : index
    %c0_17 = arith.constant 0 : index
    %55 = vector.load %arg7[%c64, %c0_17] : memref<72x256xf32, #tpu.memory_space<vmem>>, vector<8x256xf32>
    tpu.vector_store %arg7[%c64, %c0_17], %54 {strides = array<i32>} : memref<72x256xf32, #tpu.memory_space<vmem>>, vector<8x256xf32>,
    %c0_18 = arith.constant 0 : index
    %c0_19 = arith.constant 0 : index
    %56 = vector.load %arg3[%c0_18, %c0_19] : memref<8x72xf32, #tpu.memory_space<vmem>>, vector<8x72xf32>
    %c0_20 = arith.constant 0 : index
    %c0_21 = arith.constant 0 : index
    %57 = vector.load %arg7[%c0_20, %c0_21] : memref<72x256xf32, #tpu.memory_space<vmem>>, vector<72x256xf32>
    %cst_22 = arith.constant dense<0.000000e+00> : vector<8x256xf32>
    %58 = tpu.matmul %56, %57, %cst_22 {dimension_numbers = #tpu.dot_dimension_numbers<[1], [0], [0], [1], [0, 0, 1, 1], [], []>} : vector<8x72xf32>, vector<72x256xf32>, vector<8x256xf32> -> vector<8x256xf32>
    %cst_23 = arith.constant 0.000000e+00 : f32
    %59 = vector.broadcast %cst_23 : f32 to vector<8x256xf32>
    %60 = arith.maximumf %58, %59 : vector<8x256xf32>
    %c0_24 = arith.constant 0 : index
    %c0_25 = arith.constant 0 : index
    %61 = vector.load %arg4[%c0_24, %c0_25] : memref<4x8xf32, #tpu.memory_space<vmem>>, vector<4x8xf32>
    %cst_26 = arith.constant dense<0.000000e+00> : vector<4x256xf32>
    %62 = tpu.matmul %61, %60, %cst_26 {dimension_numbers = #tpu.dot_dimension_numbers<[1], [0], [0], [1], [0, 0, 1, 1], [], []>} : vector<4x8xf32>, vector<8x256xf32>, vector<4x256xf32> -> vector<4x256xf32>
    %cst_27 = arith.constant 0.000000e+00 : f32
    %63 = vector.broadcast %cst_27 : f32 to vector<4x256xf32>
    %64 = arith.maximumf %62, %63 : vector<4x256xf32>
    %65 = arith.addf %1, %64 : vector<4x256xf32>
    %c0_28 = arith.constant 0 : index
    %c0_29 = arith.constant 0 : index
    %c0_30 = arith.constant 0 : index
    %66 = vector.load %arg6[%c0_28, %c0_29, %c0_30] : memref<1x4x256xf32, #tpu.memory_space<vmem>>, vector<1x4x256xf32>
    %67 = vector.shape_cast %66 : vector<1x4x256xf32> to vector<4x256xf32>
    %68 = vector.shape_cast %65 : vector<4x256xf32> to vector<1x4x256xf32>
    tpu.vector_store %arg6[%c0_28, %c0_29, %c0_30], %68 {strides = array<i32>} : memref<1x4x256xf32, #tpu.memory_space<vmem>>, vector<1x4x256xf32>,
    return
  }
  func.func @transform_0(%arg0: i32) -> (i32, i32, i32) {
    %c0_i32 = arith.constant 0 : i32
    %c0_i32_0 = arith.constant 0 : i32
    %c0_i32_1 = arith.constant 0 : i32
    return %arg0, %c0_i32, %c0_i32_0 : i32, i32, i32
  }
  func.func @transform_1(%arg0: i32) -> (i32, i32) {
    %c0_i32 = arith.constant 0 : i32
    %c0_i32_0 = arith.constant 0 : i32
    %c0_i32_1 = arith.constant 0 : i32
    return %c0_i32, %c0_i32_0 : i32, i32
  }
  func.func @transform_2(%arg0: i32) -> (i32, i32) {
    %c0_i32 = arith.constant 0 : i32
    %c0_i32_0 = arith.constant 0 : i32
    %c0_i32_1 = arith.constant 0 : i32
    return %c0_i32, %c0_i32_0 : i32, i32
  }
  func.func @transform_3(%arg0: i32) -> (i32, i32) {
    %c0_i32 = arith.constant 0 : i32
    %c0_i32_0 = arith.constant 0 : i32
    %c0_i32_1 = arith.constant 0 : i32
    return %c0_i32, %c0_i32_0 : i32, i32
  }
  func.func @transform_4(%arg0: i32) -> (i32, i32, i32) {
    %c0_i32 = arith.constant 0 : i32
    %c0_i32_0 = arith.constant 0 : i32
    %c0_i32_1 = arith.constant 0 : i32
    %c0_i32_2 = arith.constant 0 : i32
    return %c0_i32, %c0_i32_0, %c0_i32_1 : i32, i32, i32
  }
  func.func @transform_5(%arg0: i32) -> (i32, i32, i32) {
    %c0_i32 = arith.constant 0 : i32
    %c0_i32_0 = arith.constant 0 : i32
    %c0_i32_1 = arith.constant 0 : i32
    return %arg0, %c0_i32, %c0_i32_0 : i32, i32, i32
  }
}

</mosaic_0001>

<bundles_post_ra>
// kernel: tpu_custom_call.1
= control target key start
LH: loop header
LB: loop body
LE: loop exit
PB: predicated region body
PF: predicated region fallthrough
CT: control target
= control target key end

     0   :  { %10 = vsyncpa [#allocation4], 0  ;;  %s1127_s0 = inlined_call_operand.hbm [shape: f32[2,4,256], index: 0, kind: input, shape index: {}]   ;;  %s1128_s1 = inlined_call_operand.vmem [shape: f32[8,4], index: 1, kind: input, shape index: {}]   ;;  %s1129_s2 = inlined_call_operand.vmem [shape: f32[8,72], index: 2, kind: input, shape index: {}]   ;;  %s1130_s3 = inlined_call_operand.vmem [shape: f32[4,8], index: 3, kind: input, shape index: {}]   ;;  %s1131_s4 = inlined_call_operand.hbm [shape: f32[9,1,256], index: 4, kind: input, shape index: {}]   ;;  %s1132_s5 = inlined_call_operand.hbm [shape: f32[2,4,256], index: 5, kind: output, shape index: {}]  }
   0x1   :  { %12 = vsyncpa [#allocation4 + $0x1], 0 }
   0x2   :  { %13 = vsyncpa [#allocation7], 0 }
   0x3   :  { %14 = vsyncpa [#allocation5], 0 }
   0x4   :  { %16 = vsyncpa [#allocation5 + $0x1], 0  ;;  %s939_s18 = smov 0   ;;  %s941_s19 = smov 0  }
   0x5   :  { %s943_s20 = smov 0   ;;  %s945_s21 = smov 0  }
   0x6 LB: > { %s183_s24 = sshll.u32 %s1131_s4, 4  ;;  %s963_s25 = sadd.s32 4294967295, %s896_s21   ;;  %s896_s21 = sphi %s945_s21, %s1142_s21   ;;  %s892_s20 = sphi %s943_s20, %s1141_s20   ;;  %s888_s19 = sphi %s941_s19, %s1140_s19   ;;  %s884_s18 = sphi %s939_s18, %s1139_s18   ;;  %s184_s24 = int_to_ptr.hbm [resolvable:$true] %s183_s24 }
   0x7   : > { %p674_p0 = scmp.ge.s32.totalorder %s896_s21, 1  ;;  %p43_p1 = scmp.eq.s32.totalorder %s963_s25, 0 }
   0x8   : > { %p163_p2 = scmp.lt.s32.totalorder %s896_s21, 3  ;;  %s898_s27 = smov [#allocation6]  }
   0x9   : > { %s185_s28 = sshll.u32 %s898_s27, 4  ;;  %s899_s29 = smov 32   ;;  %s186_s28 = int_to_ptr.vmem [resolvable:$true] %s185_s28 }
   0xa   : > { %p968_p3 = pnand %p674_p0, %p163_p2  ;;  %s900_s30 = smov 2  }
   0xb   : > { %s673_s6 = sadd.s32 4294967294, %s896_s21   ;;  %s979_s7 = sadd.s32 1, %s896_s21  }
   0xc   : > { %p707_p4 = pneg %p968_p3  ;;  %s29_s8 = sadd.s32 1, %s892_s20 }
   0xd   : > { %s26_s9 = ssub.s32 %s896_s21, %s979_s7  ;;  %p36_p7 = scmp.ne.s32.totalorder %s892_s20, %s888_s19 }
   0xe   : > { %p708_p6 = pnand %p707_p4, %p43_p1  ;;  %p27_p8 = scmp.eq.s32.totalorder %s26_s9, 0 }
   0xf   : > { %p37_p9 = scmp.eq.s32.totalorder %s896_s21, 0  ;;  %p42_p10 = scmp.ne.s32.totalorder %s888_s19, %s884_s18 }
  0x10   : > { %710 = dma.hbm_to_vmem [thread:$0]  (!%p708_p6), %s184_s24, 288, %s186_s28, [#allocation7], %s899_s29, %s899_s29, %s900_s30  }
  0x11   : > { %p150_p11 = scmp.eq.s32.totalorder %s963_s25, 1  ;;  %p995_p12 = por %p43_p1, %p42_p10 }
  0x12   : > { %s991_s10 = scalar_select %p27_p8, %s892_s20, %s29_s8  }
  0x13   : > { %p999_p13 = por %p150_p11, %p36_p7  ;;  %p156_p0 = scmp.eq.s32.totalorder %s673_s6, 1 }
  0x14   : > { %p38_p2 = por %p37_p9, %p36_p7  ;;  %s199_s13 = sand.u32 1, %s892_s20  }
  0x15   : > { %p1004_p4 = por %p156_p0, %p42_p10  ;;  %p720_p6 = scmp.lt.s32.totalorder %s896_s21, 2 }
  0x16   : > { %s677_s15 = sshll.u32 %s199_s13, 3  ;;  %s697_s16 = sshll.u32 %s896_s21, 3 }
  0x17   : > { %s208_s23 = scalar_lea.hbm %s1127_s0, %s697_s16  ;;  %s203_s27 = scalar_lea.vmem [#allocation3], %s677_s15 }
  0x18   : > { %s210_s24 = sshll.u32 %s208_s23, 4  ;;  %s212_s28 = sshll.u32 %s203_s27, 4  ;;  %s211_s24 = int_to_ptr.hbm [resolvable:$true] %s210_s24  ;;  %s213_s28 = int_to_ptr.vmem [resolvable:$true] %s212_s28 }
  0x19   : > { %p1013_p8 = pnand %p720_p6, %p38_p2  ;;  %s200_s30 = scalar_lea.sflag [#allocation4], %s199_s13 }
  0x1a   : > { %s796_s6 = sshra.s32 %s211_s24, 4  ;;  %s803_s15 = scalar_lea.hbm %s1127_s0, 16  ;;  %s797_s6 = int_to_ptr.hbm [resolvable:$true] %s796_s6 }
  0x1b   : > { %s798_s8 = scalar_lea.hbm %s797_s6, 8  ;;  %p800_p9 = pneg %p1013_p8 }
  0x1c   : > { %p799_p7 = scmp.ne.s32.totalorder %s797_s6, %s798_s8  ;;  %p804_p0 = scmp.lt.s32.totalorder %s797_s6, %s1127_s0 }
  0x1d   : > { %p805_p2 = scmp.lt.s32.totalorder %s803_s15, %s798_s8 }
  0x1e   : > { %p801_p10 = pnand %p800_p9, %p799_p7 }
  0x1f   : > { %p806_p6 = por %p805_p2, %p804_p0 }
  0x20   : > { %p802_p11 = pneg %p801_p10 }
  0x22   : > { %p807_p5 = pnand %p806_p6, %p802_p11 }
  0x24   : > { %810 = shalt.err (!%p807_p5)
}
  0x25   : > { %714 = dma.hbm_to_vmem [thread:$0]  (!%p1013_p8), %s211_s24, 128, %s213_s28, %s200_s30  }
  0x26   : > { %221 = sbr.rel (%p968_p3) target bundleno = 615 (0x267), region = 40  ;;  %s1030_s13 = sand.u32 (!%p968_p3), 1, %s888_s19  }
  0x27   : > { %s681_s23 = sshll.u32 (!%p968_p3), %s1030_s13, 3  ;;  %s224_s27 = scalar_lea.sflag (!%p968_p3), [#allocation4], %s1030_s13 }
  0x28   : > { %s227_s6 = scalar_lea.vmem (!%p968_p3), [#allocation3], %s681_s23 }
  0x2b   : > { %871 = dma.done.wait (%p995_p12), %s224_s27, 128  }
  0x2c   : > { %873 = vsyncadd (%p995_p12), %s224_s27, 4294967168 }
  0x2d   : > { %875 = dma.done.wait (%p43_p1), [#allocation7], 288  }
  0x2e   : > { %877 = vsyncadd (%p43_p1), [#allocation7], 4294967008  ;;  %v1044_v0 = vld [vmem:[%s227_s6] sm:$0xff]  ;;  %vm270_vm0 = vcmask 1043456   ;;  %v261_v1 = vld [vmem:[%s1128_s1] sm:$0xff]  ;;  %vm266_vm1 = vcmask 31744   ;;  %v329_v10 = vlaneseq }
  0x2f   : > { %263 = vst [vmem:[#allocation1] ss:$2 sm:$0xff] %v1044_v0  ;;  %s901_s11 = smov 113   ;;  %s902_s28 = smov 112   ;;  %v324_v12 = vld [vmem:[#allocation6 + $0x10] sm:$0x3] }
  0x30   : > { %s903_s29 = smov 111   ;;  %s904_s30 = smov 1   ;;  %v1072_v13 = vand.u32 127, %v329_v10  ;;  %v323_v15 = vld [vmem:[#allocation6 + $0xe] sm:$0x3]  ;;  %v449_v16 = vperm.slane %v324_v12, 0 }
  0x31   : > { %s905_s8 = smov 127   ;;  %s906_s9 = smov 15   ;;  %v450_v17 = vperm.slane %v324_v12, 1  ;;  %v322_v19 = vld [vmem:[#allocation6 + $0xc] sm:$0x3]  ;;  %v433_v21 = vperm.slane %v323_v15, 0 }
  0x32   : > { %s907_s16 = smov 17   ;;  %s908_s15 = smov 16   ;;  %vm429_vm2 = vcmp.lt.s32.totalorder %v1072_v13, 112  ;;  %vm445_vm3 = vcmp.lt.s32.totalorder %v1072_v13, 111  ;;  %vm413_vm4 = vcmp.lt.s32.totalorder %v1072_v13, 113  ;;  %v434_v22 = vperm.slane %v323_v15, 1 }
  0x33   : > { %v417_v29 = vperm.slane %v322_v19, 0  ;;  %v418_v30 = vperm.slane %v322_v19, 1  ;;  %v321_v33 = vld [vmem:[#allocation6 + $0xa] sm:$0x3]  ;;  %vm397_vm5 = vcmp.lt.s32.totalorder %v1072_v13, 127  ;;  %vm363_vm6 = vcmp.lt.s32.totalorder %v1072_v13, 15 }
  0x34   : > { %v401_v39 = vperm.slane %v321_v33, 0  ;;  %v402_v40 = vperm.slane %v321_v33, 1  ;;  %v320_v47 = vld [vmem:[#allocation6 + $0x6] sm:$0x3]  ;;  %v319_v48 = vld [vmem:[#allocation6 + $0x4] sm:$0x3] }
  0x35   : > { %vm379_vm7 = vcmp.lt.s32.totalorder %v1072_v13, 1  ;;  %v383_v49 = vperm.slane %v320_v47, 0  ;;  %v384_v50 = vperm.slane %v320_v47, 1  ;;  %v367_v54 = vperm.slane %v319_v48, 0  ;;  %v318_v62 = vld [vmem:[#allocation6 + $0x2] sm:$0x3] }
  0x36   : > { %v264_v2 = vld.sshfl [vmem:[#allocation1] sm:$0xff pattern:$0x75316420]  ;;  %v265_v3 = vld.sshfl [vmem:[#allocation1 + $0x8] sm:$0xff pattern:$0x75316420] }
  0x37   : > { %684 = vmatpush.msk.msra.mxu0 %vm270_vm0, %v264_v2  ;;  %686 = vmatpush.msk.msra.mxu1 %vm270_vm0, %v265_v3  ;;  %v368_v55 = vperm.slane %v319_v48, 1  ;;  %vm347_vm8 = vcmp.lt.s32.totalorder %v1072_v13, 16  ;;  %v351_v2 = vperm.slane %v318_v62, 0  ;;  %v352_v3 = vperm.slane %v318_v62, 1  ;;  %v317_v10 = vld [vmem:[#allocation6] sm:$0x3] }
  0x38   : > { %685 = vmatmul.msk.f32.vlgmr.msra.gmra.mxu0 %vm266_vm1, %v261_v1  ;;  %687 = vmatmul.msk.f32.vlgmr.msra.gmra.mxu1 %vm266_vm1, %v261_v1  ;;  %vm331_vm9 = vcmp.lt.s32.totalorder %v1072_v13, 17  ;;  %v336_v12 = vperm.slane %v317_v10, 1  ;;  %vm476_vm10 = vcmask 588800   ;;  %vm523_vm11 = vcmask 64512   ;;  %s698_s26 = sshll.u32 %s963_s25, 3  ;;  %s577_s25 = scalar_lea.sflag [#allocation5], %s1030_s13 }
  0xb5   : > { %v292_v4 = vpop.f32.mrf.mxu0  ;;  %v312_v6 = vpop.f32.mrf.mxu1 }
  0xb6   : > { %v1052_v5 = vmax.f32 %v292_v4, 0.0  ;;  %v1057_v7 = vmax.f32 %v312_v6, 0.0 }
  0xb8   : > { %409 = vrot.lane.b32.xlu2 %v1052_v5, %s901_s11  ;;  %425 = vrot.lane.b32.xlu1 %v1052_v5, %s902_s28 }
  0xb9   : > { %441 = vrot.lane.b32.xlu0 %v1052_v5, %s903_s29 }
  0xc0   : > { %411 = vrot.lane.b32.xlu2 %v1057_v7, %s901_s11  ;;  %427 = vrot.lane.b32.xlu1 %v1057_v7, %s902_s28  ;;  %s588_s28 = scalar_lea.hbm %s1132_s5, %s698_s26 }
  0xc1   : > { %443 = vrot.lane.b32.xlu0 %v1057_v7, %s903_s29  ;;  %s259_s29 = scalar_lea.vmem [#allocation8], %s681_s23  ;;  %s846_s23 = scalar_lea.hbm %s1132_s5, 16 }
  0xc8   : > { %375 = vrot.lane.b32.xlu2 %v1052_v5, %s904_s30  ;;  %395 = vrot.lane.b32.xlu1 %v1057_v7, %s905_s8 }
  0xc9   : > { %393 = vrot.lane.b32.xlu0 %v1052_v5, %s905_s8  ;;  %s592_s8 = sshll.u32 %s588_s28, 4  ;;  %s593_s8 = int_to_ptr.hbm [resolvable:$true] %s592_s8 }
  0xd0   : > { %361 = vrot.lane.b32.xlu2 %v1057_v7, %s906_s9  ;;  %359 = vrot.lane.b32.xlu1 %v1052_v5, %s906_s9  ;;  %s840_s9 = sshra.s32 %s593_s8, 4  ;;  %s841_s9 = int_to_ptr.hbm [resolvable:$true] %s840_s9 }
  0xd1   : > { %377 = vrot.lane.b32.xlu0 %v1057_v7, %s904_s30  ;;  %s590_s30 = sshll.u32 %s259_s29, 4  ;;  %p847_p12 = scmp.lt.s32.totalorder %s841_s9, %s1132_s5  ;;  %s591_s30 = int_to_ptr.vmem [resolvable:$true] %s590_s30 }
  0xd8   : > { %325 = vrot.lane.b32.xlu2 %v1052_v5, %s907_s16  ;;  %345 = vrot.lane.b32.xlu1 %v1057_v7, %s908_s15 }
  0xd9   : > { %343 = vrot.lane.b32.xlu0 %v1052_v5, %s908_s15 }
  0xe1   : > { %327 = vrot.lane.b32.xlu0 %v1057_v7, %s907_s16  ;;  %s842_s16 = scalar_lea.hbm %s841_s9, 8 }
  0xe2   : > { %p843_p1 = scmp.ne.s32.totalorder %s841_s9, %s842_s16  ;;  %p848_p8 = scmp.lt.s32.totalorder %s846_s23, %s842_s16 }
  0xe4   : > { %p844_p3 = pnand %p843_p1, %p999_p13  ;;  %p849_p7 = por %p848_p8, %p847_p12 }
  0xe6   : > { %p845_p5 = pneg %p844_p3 }
  0xe8   : > { %p850_p9 = pnand %p849_p7, %p845_p5 }
 0x112   : > { %v410_v8 = vpop.permute.xlu2 %409 }
 0x11a   : > { %v412_v14 = vpop.permute.xlu2 %411 }
 0x11b   : > { %v414_v31 = vsel %vm413_vm4, %v410_v8, %v412_v14  ;;  %v415_v32 = vsel %vm413_vm4, %v412_v14, %v410_v8 }
 0x11c   : > { %v421_v37 = vmul.f32 %v417_v29, %v414_v31  ;;  %v422_v38 = vmul.f32 %v418_v30, %v415_v32 }
 0x122   : > { %v376_v36 = vpop.permute.xlu2 %375 }
 0x12a   : > { %v426_v9 = vpop.permute.xlu1 %425  ;;  %v362_v52 = vpop.permute.xlu2 %361 }
 0x12b   : > { %v442_v11 = vpop.permute.xlu0 %441 }
 0x132   : > { %v428_v18 = vpop.permute.xlu1 %427  ;;  %v326_v14 = vpop.permute.xlu2 %325 }
 0x133   : > { %v444_v20 = vpop.permute.xlu0 %443  ;;  %v430_v23 = vsel %vm429_vm2, %v426_v9, %v428_v18  ;;  %v431_v24 = vsel %vm429_vm2, %v428_v18, %v426_v9 }
 0x134   : > { %v446_v25 = vsel %vm445_vm3, %v442_v11, %v444_v20  ;;  %v447_v26 = vsel %vm445_vm3, %v444_v20, %v442_v11  ;;  %v437_v34 = vmul.f32 %v433_v21, %v430_v23  ;;  %v438_v35 = vmul.f32 %v434_v22, %v431_v24  ;;  %v457_v20 = vld [vmem:[%s1129_s2] sm:$0xff] }
 0x135   : > { %v453_v27 = vmul.f32 %v449_v16, %v446_v25  ;;  %v454_v28 = vmul.f32 %v450_v17, %v447_v26  ;;  %v335_v11 = vperm.slane %v317_v10, 0  ;;  %v522_v24 = vld [vmem:[%s1130_s3] sm:$0xf] }
 0x137   : > { %487 = vmatpush.msra.mxu2 %v453_v27  ;;  %507 = vmatpush.msra.mxu3 %v454_v28 }
 0x139   : > { %488 = vmatpush.msra.mxu2 %v437_v34  ;;  %508 = vmatpush.msra.mxu3 %v438_v35 }
 0x13a   : > { %v396_v41 = vpop.permute.xlu1 %395 }
 0x13b   : > { %489 = vmatpush.msra.mxu2 %v421_v37  ;;  %509 = vmatpush.msra.mxu3 %v422_v38  ;;  %v394_v42 = vpop.permute.xlu0 %393 }
 0x13c   : > { %v398_v43 = vsel %vm397_vm5, %v394_v42, %v396_v41  ;;  %v399_v44 = vsel %vm397_vm5, %v396_v41, %v394_v42 }
 0x13d   : > { %v405_v45 = vmul.f32 %v401_v39, %v398_v43  ;;  %v406_v46 = vmul.f32 %v402_v40, %v399_v44 }
 0x13f   : > { %490 = vmatpush.msra.mxu2 %v405_v45  ;;  %510 = vmatpush.msra.mxu3 %v406_v46 }
 0x141   : > { %491 = vmatpush.msra.mxu2 %v1052_v5  ;;  %511 = vmatpush.msra.mxu3 %v1057_v7 }
 0x142   : > { %v360_v51 = vpop.permute.xlu1 %359 }
 0x143   : > { %v378_v53 = vpop.permute.xlu0 %377  ;;  %v364_v56 = vsel %vm363_vm6, %v360_v51, %v362_v52  ;;  %v365_v57 = vsel %vm363_vm6, %v362_v52, %v360_v51 }
 0x144   : > { %v380_v58 = vsel %vm379_vm7, %v376_v36, %v378_v53  ;;  %v381_v59 = vsel %vm379_vm7, %v378_v53, %v376_v36  ;;  %v371_v63 = vmul.f32 %v367_v54, %v365_v57  ;;  %v372_v1 = vmul.f32 %v368_v55, %v364_v56 }
 0x145   : > { %v387_v60 = vmul.f32 %v383_v49, %v381_v59  ;;  %v388_v61 = vmul.f32 %v384_v50, %v380_v58 }
 0x147   : > { %492 = vmatpush.msra.mxu2 %v387_v60  ;;  %512 = vmatpush.msra.mxu3 %v388_v61 }
 0x149   : > { %493 = vmatpush.msra.mxu2 %v371_v63  ;;  %513 = vmatpush.msra.mxu3 %v372_v1 }
 0x14a   : > { %v346_v4 = vpop.permute.xlu1 %345 }
 0x14b   : > { %v344_v5 = vpop.permute.xlu0 %343 }
 0x14c   : > { %v348_v6 = vsel %vm347_vm8, %v344_v5, %v346_v4  ;;  %v349_v7 = vsel %vm347_vm8, %v346_v4, %v344_v5 }
 0x14d   : > { %v355_v8 = vmul.f32 %v351_v2, %v349_v7  ;;  %v356_v9 = vmul.f32 %v352_v3, %v348_v6 }
 0x14f   : > { %494 = vmatpush.msra.mxu2 %v355_v8  ;;  %514 = vmatpush.msra.mxu3 %v356_v9 }
 0x153   : > { %v328_v15 = vpop.permute.xlu0 %327 }
 0x154   : > { %v332_v16 = vsel %vm331_vm9, %v326_v14, %v328_v15  ;;  %v333_v17 = vsel %vm331_vm9, %v328_v15, %v326_v14 }
 0x155   : > { %v339_v18 = vmul.f32 %v335_v11, %v333_v17  ;;  %v340_v19 = vmul.f32 %v336_v12, %v332_v16 }
 0x157   : > { %495 = vmatpush.msra.mxu2 %v339_v18  ;;  %515 = vmatpush.msra.mxu3 %v340_v19 }
 0x158   : > { %689 = vmatmul.msk.f32.vlgmr.msra.gmra.mxu3 %vm476_vm10, %v457_v20  ;;  %688 = vmatmul.msk.f32.vlgmr.msra.gmra.mxu2 %vm476_vm10, %v457_v20 }
 0x1db   : > { %v517_v21 = vpop.f32.mrf.mxu3  ;;  %v497_v13 = vpop.f32.mrf.mxu2 }
 0x1dc   : > { %v521_v22 = vmax.f32 %v517_v21, 0.0  ;;  %v520_v23 = vmax.f32 %v497_v13, 0.0 }
 0x1de   : > { %562 = vmatpush.msrb.mxu1 %v521_v22  ;;  %542 = vmatpush.msrb.mxu0 %v520_v23 }
 0x1df   : > { %691 = vmatmul.msk.f32.vlgmr.msrb.gmra.mxu1 %vm523_vm11, %v522_v24  ;;  %690 = vmatmul.msk.f32.vlgmr.msrb.gmra.mxu0 %vm523_vm11, %v522_v24 }
 0x25c   : > { %v564_v25 = vpop.f32.mrf.mxu1  ;;  %v544_v26 = vpop.f32.mrf.mxu0 }
 0x25d   : > { %v568_v27 = vmax.f32 %v564_v25, 0.0  ;;  %v567_v28 = vmax.f32 %v544_v26, 0.0 }
 0x25f   : > { %v571_v29 = vrot.slane %v568_v27, 4 }
 0x261   : > { %v572_v30 = vsel %vm270_vm0, %v567_v28, %v571_v29 }
 0x262   : > { %v574_v31 = vadd.f32 %v572_v30, %v1044_v0 }
 0x264   : > { %575 = vst [vmem:[%s259_s29] sm:$0xff] %v574_v31 }
 0x265   : > { %853 = shalt.err (!%p850_p9)
}
 0x266   : > { %705 = dma.vmem_to_hbm [thread:$0]  (%p999_p13), %s591_s30, 128, %s593_s8, %s577_s25  }
 0x267 PF: > { %s604_s13 = sand.u32 1, %s884_s18   ;;  %p1138_p10 = scmp.ge.s32.totalorder %s896_s21, 2 }
 0x268   : > { %s605_s6 = scalar_lea.sflag [#allocation5], %s604_s13 }
 0x269   : > { %p716_p11 = pnand %p1138_p10, %p1004_p4 }
 0x26b   : > { %p717_p0 = pneg %p716_p11 }
 0x26d   : > { %879 = dma.done.wait (%p717_p0), %s605_s6, 128  }
 0x26e   : > { %881 = vsyncadd (%p717_p0), %s605_s6, 4294967168  ;;  %p19_p2 = scmp.ge.s32.totalorder %s979_s7, 4   ;;  %s1139_s18 = smov %s888_s19 }
 0x26f   : > { %s1140_s19 = smov %s892_s20  ;;  %s1141_s20 = smov %s991_s10 }
 0x270   : > { %s1142_s21 = smov %s979_s7  ;;  %21 = sbr.rel (!%p19_p2) target bundleno = 6 (0x6), region = 89 }
 0x275   :  { %611 = vsyncpa [#allocation4], 1 }
 0x276   :  { %613 = vsyncpa [#allocation4 + $0x1], 1 }
 0x277   :  { %614 = vsyncpa [#allocation7], 1 }
 0x278   :  { %615 = vsyncpa [#allocation5], 1 }
 0x279   :  { %617 = vsyncpa [#allocation5 + $0x1], 1 }

</bundles_post_ra>
